<compile_context>
chip_gen: v7x
topology: tpu7x:2x2x1
jax: 0.10.0
libtpu: 0.0.40
codegen_flags: <defaults>
</compile_context>

<pallas_src>
import jax
import jax.numpy as jnp
from jax import lax
from jax.experimental import pallas as pl
from jax.experimental.pallas import tpu as pltpu

# ---- block hyperparameters (compile-time constants) ----
IN_CH = 4
OUT_CH = 8
K = 3
STRIDE = 1
PAD = 1          # 'same' spatial size for k=3, stride=1
EPS = 1e-5       # InstanceNorm2d default

_LANE = 128
_MAX_CHUNKS = 64   # cap on the trace-time-unrolled chunk count


def _round_up(x, m):
    return ((x + m - 1) // m) * m


def _cdiv(a, b):
    return -(-a // b)


def _make_kernel(NB, Cin, Cout, H, W, Wp, L_pad, C, eps):
    """Fused conv(3x3, reflect) + InstanceNorm + ReLU for an NB-sample block."""
    num_chunks = L_pad // C
    inv_valid = 1.0 / float(H * W)
    # flat offset of conv tap (dy, dx): output column p reads input column p + dy*Wp + dx
    tap_offsets = tuple(dy * Wp + dx for dy in range(K) for dx in range(K))

    def kernel(x_ref, w_ref, m_ref, o_ref):
        # x_ref: (NB, Cin, Lp_in)   reflect-padded input, rows flattened row-major
        # w_ref: (K*K, Cout, Cin)   per-tap conv weights (VMEM-resident)
        # m_ref: (1, L_pad)         1.0 on valid flattened columns (VMEM-resident)
        # o_ref: (NB, Cout, L_pad)  output; padded-width/tail columns hold garbage
        w_taps = [w_ref[t] for t in range(len(tap_offsets))]   # 9 x (Cout, Cin)

        for n in range(NB):
            # ---- pass 1: conv on the MXU, chunk accumulator in registers -------
            s_vec = jnp.zeros((Cout, C), dtype=jnp.float32)    # masked sum(y) partials
            ss_vec = jnp.zeros((Cout, C), dtype=jnp.float32)   # masked sum(y^2) partials
            for j in range(num_chunks):
                c0 = j * C                                     # static chunk start
                acc = None
                for t, d in enumerate(tap_offsets):
                    tap = x_ref[n, :, pl.ds(c0 + d, C)]        # (Cin, C), static start
                    part = jnp.dot(w_taps[t], tap,
                                   preferred_element_type=jnp.float32)
                    acc = part if acc is None else acc + part
                o_ref[n, :, pl.ds(c0, C)] = acc                # one lane-dense store
                mk = m_ref[:, pl.ds(c0, C)]                    # (1, C) validity mask
                masked = acc * mk
                s_vec = s_vec + masked
                ss_vec = ss_vec + masked * acc

            # ---- InstanceNorm statistics over the valid spatial positions ------
            s = jnp.sum(s_vec, axis=1, keepdims=True)          # (Cout, 1)
            ss = jnp.sum(ss_vec, axis=1, keepdims=True)        # (Cout, 1)
            mean = s * inv_valid
            var = jnp.maximum(ss * inv_valid - mean * mean, 0.0)   # clamp (review)
            scale = lax.rsqrt(var + eps)
            shift = -mean * scale
            scale_b = jnp.broadcast_to(scale, (Cout, C))       # hoisted broadcasts
            shift_b = jnp.broadcast_to(shift, (Cout, C))

            # ---- pass 2: normalize + ReLU in place (VMEM-only traffic) ---------
            for j in range(num_chunks):
                c0 = j * C
                y = o_ref[n, :, pl.ds(c0, C)]
                o_ref[n, :, pl.ds(c0, C)] = jnp.maximum(y * scale_b + shift_b, 0.0)

    return kernel


def conv_norm_act_block(x_nchw, weight, bias=None, *, chunk_cols=512,
                        samples_per_step=None,
                        block_vmem_budget_bytes=16 * 1024 * 1024):
    """Forward pass of ConvNormActBlock(in=4, out=8, k=3, s=1, pad=1, reflect,
    norm='instance', act='relu').

    x_nchw : (N, Cin, H, W) float32
    weight : (Cout, Cin, K, K) float32   (PyTorch Conv2d weight layout)
    bias   : (Cout,) float32 -- accepted for interface parity but unused: a
             per-channel constant is exactly cancelled by InstanceNorm's mean
             subtraction, so dropping it is numerically identical.
    returns: (N, Cout, H, W) float32 (NCHW)
    """
    del bias  # cancelled by InstanceNorm2d(affine=False)
    N, Cin, H, W = x_nchw.shape
    Cout, Cin_w, Kh, Kw = weight.shape
    assert Cin == IN_CH and Cout == OUT_CH and Cin_w == Cin and Kh == K and Kw == K

    Hp, Wp = H + 2 * PAD, W + 2 * PAD
    L = H * Wp                              # flattened output length (padded width kept)

    # Lane-chunk width: multiple of 128; widened if needed to cap the unrolled
    # chunk count.  Output flat length padded to a whole number of chunks so every
    # kernel store is a full, unmasked vreg store (lane-dense out_spec).
    C = min(_round_up(L, _LANE), _round_up(chunk_cols, _LANE))
    if _cdiv(L, C) > _MAX_CHUNKS:
        C = _round_up(_cdiv(L, _MAX_CHUNKS), _LANE)
    L_pad = _cdiv(L, C) * C
    # the last tap of the last chunk reads up to this many input columns
    L_in = L_pad + (K - 1) * Wp + (K - 1)

    # ---- padded input, materialized once in HBM ----
    x = x_nchw.astype(jnp.float32)
    tail = L_in - Hp * Wp                   # > 0 always (L_pad >= H*Wp)
    extra_rows = _cdiv(tail, Wp)
    if PAD + extra_rows <= H - 1:
        # fold the tap-overrun tail into the same reflect pad: the extra reflected
        # rows only feed masked / discarded columns, values are irrelevant.
        xp = jnp.pad(x, ((0, 0), (0, 0), (PAD, PAD + extra_rows), (PAD, PAD)),
                     mode="reflect")
        x_flat = xp.reshape(N, Cin, (Hp + extra_rows) * Wp)
    else:
        xp = jnp.pad(x, ((0, 0), (0, 0), (PAD, PAD), (PAD, PAD)), mode="reflect")
        x_flat = jnp.pad(xp.reshape(N, Cin, Hp * Wp), ((0, 0), (0, 0), (0, tail)))
    Lp_in = x_flat.shape[-1]

    # conv weight (Cout,Cin,K,K) -> (K*K, Cout, Cin): one small MXU LHS per tap
    w_taps = jnp.transpose(weight, (2, 3, 0, 1)).reshape(K * K, Cout, Cin)
    w_taps = w_taps.astype(jnp.float32)

    # validity mask over the flattened (H, Wp) grid + trailing chunk padding
    col = jnp.arange(L_pad, dtype=jnp.int32)
    mask = (((col % Wp) < W) & (col < L)).astype(jnp.float32).reshape(1, L_pad)

    # ---- samples per grid step: VMEM-aware, keep >= 2 parallel steps (megacore)
    per_sample_bytes = 4 * (Cin * Lp_in + Cout * L_pad)
    if samples_per_step is None:
        NB = 1
        nb_cap = max(1, min(N // 2, 8))     # leave >= 2 grid steps when N >= 2
        for d in range(nb_cap, 0, -1):
            if N % d == 0 and 2 * d * per_sample_bytes <= block_vmem_budget_bytes:
                NB = d
                break
    else:
        NB = samples_per_step
        assert N % NB == 0
    grid = (N // NB,)

    # explicit scoped-VMEM request: double-buffered in/out blocks + mask + slack
    vmem_limit = max(32 * 1024 * 1024,
                     2 * NB * per_sample_bytes + 8 * L_pad + (4 << 20))

    kernel = _make_kernel(NB, Cin, Cout, H, W, Wp, L_pad, C, EPS)

    out = pl.pallas_call(
        kernel,
        out_shape=jax.ShapeDtypeStruct((N, Cout, L_pad), jnp.float32),
        grid=grid,
        in_specs=[
            pl.BlockSpec((NB, Cin, Lp_in), lambda i: (i, 0, 0)),
            pl.BlockSpec((K * K, Cout, Cin), lambda i: (0, 0, 0)),   # resident weights
            pl.BlockSpec((1, L_pad), lambda i: (0, 0)),              # resident mask
        ],
        out_specs=pl.BlockSpec((NB, Cout, L_pad), lambda i: (i, 0, 0)),
        compiler_params=pltpu.CompilerParams(
            dimension_semantics=("parallel",),
            vmem_limit_bytes=int(vmem_limit)),
    )(x_flat, w_taps, mask)

    # (N, Cout, L_pad) -> drop chunk padding and padded-width columns -> NCHW.
    return out[:, :, :L].reshape(N, Cout, H, Wp)[:, :, :, :W]


def _reference(x, weight, bias):
    """Pure-JAX reference of the PyTorch block (conv+bias -> InstanceNorm -> ReLU)."""
    xp = jnp.pad(x, ((0, 0), (0, 0), (PAD, PAD), (PAD, PAD)), mode="reflect")
    y = lax.conv_general_dilated(xp, weight, window_strides=(STRIDE, STRIDE),
                                 padding="VALID",
                                 dimension_numbers=("NCHW", "OIHW", "NCHW"))
    y = y + bias[None, :, None, None]
    mean = jnp.mean(y, axis=(2, 3), keepdims=True)
    var = jnp.mean((y - mean) ** 2, axis=(2, 3), keepdims=True)
    y = (y - mean) * lax.rsqrt(var + EPS)
    return jnp.maximum(y, 0.0)


if __name__ == "__main__":
    key = jax.random.PRNGKey(0)
    kx, kw, kb = jax.random.split(key, 3)

    # Deterministic synthetic parameters (PyTorch Conv2d shapes).
    x = jax.random.normal(kx, (2, IN_CH, 16, 16), dtype=jnp.float32)
    weight = jax.random.normal(kw, (OUT_CH, IN_CH, K, K), dtype=jnp.float32) * 0.1
    bias = jax.random.normal(kb, (OUT_CH,), dtype=jnp.float32) * 0.1

    y = conv_norm_act_block(x, weight, bias)
    jax.block_until_ready(y)

    assert y.shape == (2, OUT_CH, 16, 16)
    assert bool(jnp.all(y >= 0.0))          # ReLU output is non-negative
    assert bool(jnp.all(jnp.isfinite(y)))

    # Numerical check against the pure-JAX reference (bias included in reference;
    # it is cancelled by InstanceNorm, so results must still match).
    y_ref = _reference(x, weight, bias)
    assert bool(jnp.allclose(y, y_ref, atol=1e-3, rtol=1e-3))

    print("KERNEL_OK")
</pallas_src>

<mosaic_0001>
module attributes {stable_mosaic.version = 11 : i64} {
  func.func @kernel(%arg0: i32, %arg1: memref<1x4x432xf32, #tpu.memory_space<vmem>>, %arg2: memref<9x8x4xf32, #tpu.memory_space<vmem>>, %arg3: memref<1x384xf32, #tpu.memory_space<vmem>>, %arg4: memref<1x8x384xf32, #tpu.memory_space<vmem>>) attributes {dimension_semantics = [#tpu.dimension_semantics<parallel>], iteration_bounds = array<i64: 2>, scalar_prefetch = 0 : i64, scratch_operands = 0 : i64, tpu.core_type = #tpu.core_type<tc>, window_params = [{transform_indices = @transform_0, window_bounds = array<i64: 1, 4, 432>}, {pipeline_mode = #tpu.pipeline_mode<synchronous>, transform_indices = @transform_1, window_bounds = array<i64: 9, 8, 4>}, {pipeline_mode = #tpu.pipeline_mode<synchronous>, transform_indices = @transform_2, window_bounds = array<i64: 1, 384>}, {transform_indices = @transform_3, window_bounds = array<i64: 1, 8, 384>}]} {
    %c0 = arith.constant 0 : index
    %c0_0 = arith.constant 0 : index
    %c0_1 = arith.constant 0 : index
    %0 = vector.load %arg2[%c0, %c0_0, %c0_1] : memref<9x8x4xf32, #tpu.memory_space<vmem>>, vector<1x8x4xf32>
    %1 = vector.shape_cast %0 : vector<1x8x4xf32> to vector<8x4xf32>
    %c1 = arith.constant 1 : index
    %c0_2 = arith.constant 0 : index
    %c0_3 = arith.constant 0 : index
    %2 = vector.load %arg2[%c1, %c0_2, %c0_3] : memref<9x8x4xf32, #tpu.memory_space<vmem>>, vector<1x8x4xf32>
    %3 = vector.shape_cast %2 : vector<1x8x4xf32> to vector<8x4xf32>
    %c2 = arith.constant 2 : index
    %c0_4 = arith.constant 0 : index
    %c0_5 = arith.constant 0 : index
    %4 = vector.load %arg2[%c2, %c0_4, %c0_5] : memref<9x8x4xf32, #tpu.memory_space<vmem>>, vector<1x8x4xf32>
    %5 = vector.shape_cast %4 : vector<1x8x4xf32> to vector<8x4xf32>
    %c3 = arith.constant 3 : index
    %c0_6 = arith.constant 0 : index
    %c0_7 = arith.constant 0 : index
    %6 = vector.load %arg2[%c3, %c0_6, %c0_7] : memref<9x8x4xf32, #tpu.memory_space<vmem>>, vector<1x8x4xf32>
    %7 = vector.shape_cast %6 : vector<1x8x4xf32> to vector<8x4xf32>
    %c4 = arith.constant 4 : index
    %c0_8 = arith.constant 0 : index
    %c0_9 = arith.constant 0 : index
    %8 = vector.load %arg2[%c4, %c0_8, %c0_9] : memref<9x8x4xf32, #tpu.memory_space<vmem>>, vector<1x8x4xf32>
    %9 = vector.shape_cast %8 : vector<1x8x4xf32> to vector<8x4xf32>
    %c5 = arith.constant 5 : index
    %c0_10 = arith.constant 0 : index
    %c0_11 = arith.constant 0 : index
    %10 = vector.load %arg2[%c5, %c0_10, %c0_11] : memref<9x8x4xf32, #tpu.memory_space<vmem>>, vector<1x8x4xf32>
    %11 = vector.shape_cast %10 : vector<1x8x4xf32> to vector<8x4xf32>
    %c6 = arith.constant 6 : index
    %c0_12 = arith.constant 0 : index
    %c0_13 = arith.constant 0 : index
    %12 = vector.load %arg2[%c6, %c0_12, %c0_13] : memref<9x8x4xf32, #tpu.memory_space<vmem>>, vector<1x8x4xf32>
    %13 = vector.shape_cast %12 : vector<1x8x4xf32> to vector<8x4xf32>
    %c7 = arith.constant 7 : index
    %c0_14 = arith.constant 0 : index
    %c0_15 = arith.constant 0 : index
    %14 = vector.load %arg2[%c7, %c0_14, %c0_15] : memref<9x8x4xf32, #tpu.memory_space<vmem>>, vector<1x8x4xf32>
    %15 = vector.shape_cast %14 : vector<1x8x4xf32> to vector<8x4xf32>
    %c8 = arith.constant 8 : index
    %c0_16 = arith.constant 0 : index
    %c0_17 = arith.constant 0 : index
    %16 = vector.load %arg2[%c8, %c0_16, %c0_17] : memref<9x8x4xf32, #tpu.memory_space<vmem>>, vector<1x8x4xf32>
    %17 = vector.shape_cast %16 : vector<1x8x4xf32> to vector<8x4xf32>
    %cst = arith.constant 0.000000e+00 : f32
    %18 = vector.broadcast %cst : f32 to vector<8x384xf32>
    %cst_18 = arith.constant 0.000000e+00 : f32
    %19 = vector.broadcast %cst_18 : f32 to vector<8x384xf32>
    %c0_19 = arith.constant 0 : index
    %c0_20 = arith.constant 0 : index
    %c0_21 = arith.constant 0 : index
    %20 = vector.load %arg1[%c0_19, %c0_20, %c0_21] : memref<1x4x432xf32, #tpu.memory_space<vmem>>, vector<1x4x384xf32>
    %21 = vector.shape_cast %20 : vector<1x4x384xf32> to vector<4x384xf32>
    %cst_22 = arith.constant dense<0.000000e+00> : vector<8x384xf32>
    %22 = tpu.matmul %1, %21, %cst_22 {dimension_numbers = #tpu.dot_dimension_numbers<[1], [0], [0], [1], [0, 0, 1, 1], [], []>} : vector<8x4xf32>, vector<4x384xf32>, vector<8x384xf32> -> vector<8x384xf32>
    %c0_23 = arith.constant 0 : index
    %c0_24 = arith.constant 0 : index
    %c1_25 = arith.constant 1 : index
    %23 = vector.load %arg1[%c0_23, %c0_24, %c1_25] : memref<1x4x432xf32, #tpu.memory_space<vmem>>, vector<1x4x384xf32>
    %24 = vector.shape_cast %23 : vector<1x4x384xf32> to vector<4x384xf32>
    %cst_26 = arith.constant dense<0.000000e+00> : vector<8x384xf32>
    %25 = tpu.matmul %3, %24, %cst_26 {dimension_numbers = #tpu.dot_dimension_numbers<[1], [0], [0], [1], [0, 0, 1, 1], [], []>} : vector<8x4xf32>, vector<4x384xf32>, vector<8x384xf32> -> vector<8x384xf32>
    %26 = arith.addf %22, %25 : vector<8x384xf32>
    %c0_27 = arith.constant 0 : index
    %c0_28 = arith.constant 0 : index
    %c2_29 = arith.constant 2 : index
    %27 = vector.load %arg1[%c0_27, %c0_28, %c2_29] : memref<1x4x432xf32, #tpu.memory_space<vmem>>, vector<1x4x384xf32>
    %28 = vector.shape_cast %27 : vector<1x4x384xf32> to vector<4x384xf32>
    %cst_30 = arith.constant dense<0.000000e+00> : vector<8x384xf32>
    %29 = tpu.matmul %5, %28, %cst_30 {dimension_numbers = #tpu.dot_dimension_numbers<[1], [0], [0], [1], [0, 0, 1, 1], [], []>} : vector<8x4xf32>, vector<4x384xf32>, vector<8x384xf32> -> vector<8x384xf32>
    %30 = arith.addf %26, %29 : vector<8x384xf32>
    %c0_31 = arith.constant 0 : index
    %c0_32 = arith.constant 0 : index
    %c18 = arith.constant 18 : index
    %31 = vector.load %arg1[%c0_31, %c0_32, %c18] : memref<1x4x432xf32, #tpu.memory_space<vmem>>, vector<1x4x384xf32>
    %32 = vector.shape_cast %31 : vector<1x4x384xf32> to vector<4x384xf32>
    %cst_33 = arith.constant dense<0.000000e+00> : vector<8x384xf32>
    %33 = tpu.matmul %7, %32, %cst_33 {dimension_numbers = #tpu.dot_dimension_numbers<[1], [0], [0], [1], [0, 0, 1, 1], [], []>} : vector<8x4xf32>, vector<4x384xf32>, vector<8x384xf32> -> vector<8x384xf32>
    %34 = arith.addf %30, %33 : vector<8x384xf32>
    %c0_34 = arith.constant 0 : index
    %c0_35 = arith.constant 0 : index
    %c19 = arith.constant 19 : index
    %35 = vector.load %arg1[%c0_34, %c0_35, %c19] : memref<1x4x432xf32, #tpu.memory_space<vmem>>, vector<1x4x384xf32>
    %36 = vector.shape_cast %35 : vector<1x4x384xf32> to vector<4x384xf32>
    %cst_36 = arith.constant dense<0.000000e+00> : vector<8x384xf32>
    %37 = tpu.matmul %9, %36, %cst_36 {dimension_numbers = #tpu.dot_dimension_numbers<[1], [0], [0], [1], [0, 0, 1, 1], [], []>} : vector<8x4xf32>, vector<4x384xf32>, vector<8x384xf32> -> vector<8x384xf32>
    %38 = arith.addf %34, %37 : vector<8x384xf32>
    %c0_37 = arith.constant 0 : index
    %c0_38 = arith.constant 0 : index
    %c20 = arith.constant 20 : index
    %39 = vector.load %arg1[%c0_37, %c0_38, %c20] : memref<1x4x432xf32, #tpu.memory_space<vmem>>, vector<1x4x384xf32>
    %40 = vector.shape_cast %39 : vector<1x4x384xf32> to vector<4x384xf32>
    %cst_39 = arith.constant dense<0.000000e+00> : vector<8x384xf32>
    %41 = tpu.matmul %11, %40, %cst_39 {dimension_numbers = #tpu.dot_dimension_numbers<[1], [0], [0], [1], [0, 0, 1, 1], [], []>} : vector<8x4xf32>, vector<4x384xf32>, vector<8x384xf32> -> vector<8x384xf32>
    %42 = arith.addf %38, %41 : vector<8x384xf32>
    %c0_40 = arith.constant 0 : index
    %c0_41 = arith.constant 0 : index
    %c36 = arith.constant 36 : index
    %43 = vector.load %arg1[%c0_40, %c0_41, %c36] : memref<1x4x432xf32, #tpu.memory_space<vmem>>, vector<1x4x384xf32>
    %44 = vector.shape_cast %43 : vector<1x4x384xf32> to vector<4x384xf32>
    %cst_42 = arith.constant dense<0.000000e+00> : vector<8x384xf32>
    %45 = tpu.matmul %13, %44, %cst_42 {dimension_numbers = #tpu.dot_dimension_numbers<[1], [0], [0], [1], [0, 0, 1, 1], [], []>} : vector<8x4xf32>, vector<4x384xf32>, vector<8x384xf32> -> vector<8x384xf32>
    %46 = arith.addf %42, %45 : vector<8x384xf32>
    %c0_43 = arith.constant 0 : index
    %c0_44 = arith.constant 0 : index
    %c37 = arith.constant 37 : index
    %47 = vector.load %arg1[%c0_43, %c0_44, %c37] : memref<1x4x432xf32, #tpu.memory_space<vmem>>, vector<1x4x384xf32>
    %48 = vector.shape_cast %47 : vector<1x4x384xf32> to vector<4x384xf32>
    %cst_45 = arith.constant dense<0.000000e+00> : vector<8x384xf32>
    %49 = tpu.matmul %15, %48, %cst_45 {dimension_numbers = #tpu.dot_dimension_numbers<[1], [0], [0], [1], [0, 0, 1, 1], [], []>} : vector<8x4xf32>, vector<4x384xf32>, vector<8x384xf32> -> vector<8x384xf32>
    %50 = arith.addf %46, %49 : vector<8x384xf32>
    %c0_46 = arith.constant 0 : index
    %c0_47 = arith.constant 0 : index
    %c38 = arith.constant 38 : index
    %51 = vector.load %arg1[%c0_46, %c0_47, %c38] : memref<1x4x432xf32, #tpu.memory_space<vmem>>, vector<1x4x384xf32>
    %52 = vector.shape_cast %51 : vector<1x4x384xf32> to vector<4x384xf32>
    %cst_48 = arith.constant dense<0.000000e+00> : vector<8x384xf32>
    %53 = tpu.matmul %17, %52, %cst_48 {dimension_numbers = #tpu.dot_dimension_numbers<[1], [0], [0], [1], [0, 0, 1, 1], [], []>} : vector<8x4xf32>, vector<4x384xf32>, vector<8x384xf32> -> vector<8x384xf32>
    %54 = arith.addf %50, %53 : vector<8x384xf32>
    %c0_49 = arith.constant 0 : index
    %c0_50 = arith.constant 0 : index
    %c0_51 = arith.constant 0 : index
    %55 = vector.load %arg4[%c0_49, %c0_50, %c0_51] : memref<1x8x384xf32, #tpu.memory_space<vmem>>, vector<1x8x384xf32>
    %56 = vector.shape_cast %55 : vector<1x8x384xf32> to vector<8x384xf32>
    %57 = vector.shape_cast %54 : vector<8x384xf32> to vector<1x8x384xf32>
    tpu.vector_store %arg4[%c0_49, %c0_50, %c0_51], %57 {strides = array<i32>} : memref<1x8x384xf32, #tpu.memory_space<vmem>>, vector<1x8x384xf32>,
    %c0_52 = arith.constant 0 : index
    %c0_53 = arith.constant 0 : index
    %58 = vector.load %arg3[%c0_52, %c0_53] : memref<1x384xf32, #tpu.memory_space<vmem>>, vector<1x384xf32>
    %59 = vector.broadcast %58 : vector<1x384xf32> to vector<8x384xf32>
    %60 = arith.mulf %54, %59 : vector<8x384xf32>
    %61 = arith.addf %18, %60 : vector<8x384xf32>
    %62 = arith.mulf %60, %54 : vector<8x384xf32>
    %63 = arith.addf %19, %62 : vector<8x384xf32>
    %cst_54 = arith.constant dense<0.000000e+00> : vector<8xf32>
    %64 = vector.multi_reduction <add>, %61, %cst_54 [1] : vector<8x384xf32> to vector<8xf32>
    %65 = vector.shape_cast %64 : vector<8xf32> to vector<8x1xf32>
    %cst_55 = arith.constant dense<0.000000e+00> : vector<8xf32>
    %66 = vector.multi_reduction <add>, %63, %cst_55 [1] : vector<8x384xf32> to vector<8xf32>
    %67 = vector.shape_cast %66 : vector<8xf32> to vector<8x1xf32>
    %cst_56 = arith.constant 3.906250e-03 : f32
    %68 = vector.broadcast %cst_56 : f32 to vector<8x1xf32>
    %69 = arith.mulf %65, %68 : vector<8x1xf32>
    %cst_57 = arith.constant 3.906250e-03 : f32
    %70 = vector.broadcast %cst_57 : f32 to vector<8x1xf32>
    %71 = arith.mulf %67, %70 : vector<8x1xf32>
    %72 = arith.mulf %69, %69 : vector<8x1xf32>
    %73 = arith.subf %71, %72 : vector<8x1xf32>
    %cst_58 = arith.constant 0.000000e+00 : f32
    %74 = vector.broadcast %cst_58 : f32 to vector<8x1xf32>
    %75 = arith.maximumf %73, %74 : vector<8x1xf32>
    %cst_59 = arith.constant 9.99999974E-6 : f32
    %76 = vector.broadcast %cst_59 : f32 to vector<8x1xf32>
    %77 = arith.addf %75, %76 : vector<8x1xf32>
    %78 = math.rsqrt %77 : vector<8x1xf32>
    %cst_60 = arith.constant 0.000000e+00 : f32
    %79 = vector.broadcast %cst_60 : f32 to vector<8x1xf32>
    %80 = arith.subf %79, %69 : vector<8x1xf32>
    %81 = arith.mulf %80, %78 : vector<8x1xf32>
    %82 = vector.shape_cast %78 : vector<8x1xf32> to vector<8x1xf32>
    %83 = vector.broadcast %82 : vector<8x1xf32> to vector<8x384xf32>
    %84 = vector.shape_cast %81 : vector<8x1xf32> to vector<8x1xf32>
    %85 = vector.broadcast %84 : vector<8x1xf32> to vector<8x384xf32>
    %c0_61 = arith.constant 0 : index
    %c0_62 = arith.constant 0 : index
    %c0_63 = arith.constant 0 : index
    %86 = vector.load %arg4[%c0_61, %c0_62, %c0_63] : memref<1x8x384xf32, #tpu.memory_space<vmem>>, vector<1x8x384xf32>
    %87 = vector.shape_cast %86 : vector<1x8x384xf32> to vector<8x384xf32>
    %88 = arith.mulf %87, %83 : vector<8x384xf32>
    %89 = arith.addf %88, %85 : vector<8x384xf32>
    %cst_64 = arith.constant 0.000000e+00 : f32
    %90 = vector.broadcast %cst_64 : f32 to vector<8x384xf32>
    %91 = arith.maximumf %89, %90 : vector<8x384xf32>
    %c0_65 = arith.constant 0 : index
    %c0_66 = arith.constant 0 : index
    %c0_67 = arith.constant 0 : index
    %92 = vector.load %arg4[%c0_65, %c0_66, %c0_67] : memref<1x8x384xf32, #tpu.memory_space<vmem>>, vector<1x8x384xf32>
    %93 = vector.shape_cast %92 : vector<1x8x384xf32> to vector<8x384xf32>
    %94 = vector.shape_cast %91 : vector<8x384xf32> to vector<1x8x384xf32>
    tpu.vector_store %arg4[%c0_65, %c0_66, %c0_67], %94 {strides = array<i32>} : memref<1x8x384xf32, #tpu.memory_space<vmem>>, vector<1x8x384xf32>,
    return
  }
  func.func @transform_0(%arg0: i32) -> (i32, i32, i32) {
    %c0_i32 = arith.constant 0 : i32
    %c0_i32_0 = arith.constant 0 : i32
    %c0_i32_1 = arith.constant 0 : i32
    return %arg0, %c0_i32, %c0_i32_0 : i32, i32, i32
  }
  func.func @transform_1(%arg0: i32) -> (i32, i32, i32) {
    %c0_i32 = arith.constant 0 : i32
    %c0_i32_0 = arith.constant 0 : i32
    %c0_i32_1 = arith.constant 0 : i32
    %c0_i32_2 = arith.constant 0 : i32
    return %c0_i32, %c0_i32_0, %c0_i32_1 : i32, i32, i32
  }
  func.func @transform_2(%arg0: i32) -> (i32, i32) {
    %c0_i32 = arith.constant 0 : i32
    %c0_i32_0 = arith.constant 0 : i32
    %c0_i32_1 = arith.constant 0 : i32
    return %c0_i32, %c0_i32_0 : i32, i32
  }
  func.func @transform_3(%arg0: i32) -> (i32, i32, i32) {
    %c0_i32 = arith.constant 0 : i32
    %c0_i32_0 = arith.constant 0 : i32
    %c0_i32_1 = arith.constant 0 : i32
    return %arg0, %c0_i32, %c0_i32_0 : i32, i32, i32
  }
}

</mosaic_0001>

<bundles_post_ra>
// kernel: tpu_custom_call.1
= control target key start
LH: loop header
LB: loop body
LE: loop exit
PB: predicated region body
PF: predicated region fallthrough
CT: control target
= control target key end

     0   :  { %8 = vsyncpa [#allocation3], 0  ;;  %s2401_s0 = inlined_call_operand.vmem [shape: f32[2,4,432], index: 0, kind: input, shape index: {}]   ;;  %s2402_s1 = inlined_call_operand.vmem [shape: f32[9,8,4], index: 1, kind: input, shape index: {}]   ;;  %s2403_s2 = inlined_call_operand.vmem [shape: f32[1,384], index: 2, kind: input, shape index: {}]   ;;  %s2404_s3 = inlined_call_operand.hbm [shape: f32[2,8,384], index: 3, kind: output, shape index: {}]  }
   0x1   :  { %10 = vsyncpa [#allocation3 + $0x1], 0  ;;  %s2151_s12 = smov 0   ;;  %s2153_s13 = smov 0  }
   0x2   :  { %s2155_s14 = smov 0   ;;  %s2157_s15 = smov 0  }
   0x3 LB: > { %s2172_s16 = sadd.s32 4294967295, %s2118_s15   ;;  %s1843_s17 = sadd.s32 4294967294, %s2118_s15   ;;  %s2118_s15 = sphi %s2157_s15, %s2410_s15   ;;  %s2114_s14 = sphi %s2155_s14, %s2409_s14   ;;  %s2110_s13 = sphi %s2153_s13, %s2408_s13   ;;  %s2106_s12 = sphi %s2151_s12, %s2407_s12  }
   0x4   : > { %s2176_s18 = sadd.s32 1, %s2118_s15   ;;  %s91_s19 = sadd.s32 1, %s2114_s14 }
   0x5   : > { %s88_s20 = ssub.s32 %s2118_s15, %s2176_s18  ;;  %p101_p0 = scmp.ne.s32.totalorder %s2114_s14, %s2110_s13 }
   0x6   : > { %p89_p1 = scmp.eq.s32.totalorder %s88_s20, 0  ;;  %p102_p2 = scmp.eq.s32.totalorder %s2172_s16, 1 }
   0x7   : > { %p107_p3 = scmp.ne.s32.totalorder %s2110_s13, %s2106_s12  ;;  %p108_p4 = scmp.eq.s32.totalorder %s1843_s17, 1 }
   0x8   : > { %s2187_s21 = scalar_select %p89_p1, %s2114_s14, %s91_s19  }
   0x9   : > { %p2189_p5 = por %p102_p2, %p101_p0  ;;  %p2193_p6 = por %p108_p4, %p107_p3 }
   0xa   : > { %p1846_p7 = scmp.ge.s32.totalorder %s2118_s15, 1  ;;  %p140_p8 = scmp.lt.s32.totalorder %s2118_s15, 3 }
   0xc   : > { %p141_p9 = pnand %p1846_p7, %p140_p8 }
   0xd   : > { %p164_p10 = scmp.lt.s32.totalorder (!%p141_p9), %s2172_s16, 1  ;;  %v2120_v0 = vmov (!%p141_p9), 0.0   ;;  %vm2121_vm0 = vmmov (!%p141_p9), 0   ;;  %s2122_s29 = smov (!%p141_p9), 127   ;;  %vm201_vm1 = vcmask (!%p141_p9), 1039360   ;;  %vm209_vm2 = vcmask (!%p141_p9), 1043456  }
   0xe   : > { %144 = sbr.rel (%p141_p9) target bundleno = 617 (0x269), region = 32  ;;  %1924 = vmatprep.subr.mxu1 (!%p141_p9), %v2120_v0  ;;  %1926 = vmatprep.mubr.msk.f32.mxu1 (!%p141_p9), %vm2121_vm0, %v2120_v0  ;;  %s2123_s30 = smov (!%p141_p9), 126   ;;  %v1849_v9 = vld [vmem:[%s2402_s1 + $0x8] sm:$0xff] (!%p141_p9)  ;;  %vm205_vm3 = vcmask (!%p141_p9), 31744   ;;  %vm522_vm4 = vcmask (!%p141_p9), 1031168   ;;  %v169_v19 = vld [vmem:[%s2402_s1] sm:$0xff] (!%p141_p9) }
   0xf   : > { %280 = vmatprep.mubr.f32.mxu0 (!%p141_p9), %v2120_v0  ;;  %s2124_s4 = smov (!%p141_p9), 110   ;;  %s2125_s5 = smov (!%p141_p9), 109   ;;  %vm693_vm5 = vcmask (!%p141_p9), 900096   ;;  %v1850_v27 = vld [vmem:[%s2402_s1 + $0x10] sm:$0xff] (!%p141_p9)  ;;  %vm864_vm6 = vcmask (!%p141_p9), 891904   ;;  %v1851_v35 = vld [vmem:[%s2402_s1 + $0x18] sm:$0xff] (!%p141_p9) }
  0x10   : > { %s2126_s6 = smov (!%p141_p9), 108   ;;  %s2127_s7 = smov (!%p141_p9), 92   ;;  %vm1035_vm7 = vcmask (!%p141_p9), 883712   ;;  %v1852_v43 = vld [vmem:[%s2402_s1 + $0x20] sm:$0xff] (!%p141_p9)  ;;  %vm1206_vm8 = vcmask (!%p141_p9), 752640   ;;  %v1853_v51 = vld [vmem:[%s2402_s1 + $0x28] sm:$0xff] (!%p141_p9) }
  0x11   : > { %s2128_s8 = smov (!%p141_p9), 91   ;;  %s2129_s9 = smov (!%p141_p9), 90   ;;  %vm1377_vm9 = vcmask (!%p141_p9), 744448   ;;  %v1854_v59 = vld [vmem:[%s2402_s1 + $0x30] sm:$0xff] (!%p141_p9)  ;;  %vm1548_vm10 = vcmask (!%p141_p9), 736256  }
  0x12   : > { %s161_s17 = sand.u32 (!%p141_p9), 1, %s2110_s13   ;;  %s2002_s20 = smul.u32 (!%p141_p9), 384, %s2172_s16 }
  0x13   : > { %s2001_s19 = smul.u32 (!%p141_p9), 24, %s161_s17 }
  0x15   : > { %s165_s24 = scalar_select %p164_p10, %s2172_s16, 1 }
  0x16   : > { %s1770_s16 = scalar_lea.sflag [#allocation3], %s161_s17 }
  0x17   : > { %s1905_s25 = sshll.u32 %s165_s24, 4  ;;  %s163_s24 = scalar_lea.vmem [#allocation2], %s2001_s19 }
  0x18   : > { %s2208_s28 = scalar_lea.vmem %s2401_s0, %s1905_s25  ;;  %s1784_s25 = sshll.u32 %s163_s24, 4  ;;  %s2361_s25 = int_to_ptr.vmem [resolvable:$true] %s1784_s25 }
  0x19   : > { %v2211_v1 = vld [vmem:[%s2208_s28] sm:$0xff]  ;;  %v188_v2 = vld [vmem:[%s2208_s28 + $0x8] sm:$0xff] }
  0x1a   : > { %193 = vrot.lane.b32.xlu1 %v2211_v1, %s2122_s29  ;;  %v191_v3 = vcombine.high %v2211_v1, %v2211_v1  ;;  %v192_v4 = vcombine.high %v188_v2, %v188_v2  ;;  %v187_v14 = vld [vmem:[%s2208_s28 + $0x8] sm:$0xf]  ;;  %s2359_s28 = scalar_lea.hbm %s2404_s3, %s2002_s20 }
  0x1c   : > { %195 = vrot.lane.b32.xlu0 %v191_v3, %s2122_s29 }
  0x1e   : > { %199 = vrot.lane.b32.xlu1 %v192_v4, %s2122_s29 }
  0x20   : > { %197 = vrot.lane.b32.xlu0 %v188_v2, %s2122_s29  ;;  %s2056_s29 = scalar_lea.vmem %s2361_s25, 384 }
  0x21   : > { %p2057_p11 = scmp.ne.s32.totalorder %s2361_s25, %s2056_s29 }
  0x22   : > { %518 = vrot.lane.b32.xlu1 %v188_v2, %s2123_s30 }
  0x23   : > { %p2058_p12 = pnand %p2057_p11, %p2189_p5 }
  0x24   : > { %516 = vrot.lane.b32.xlu0 %v191_v3, %s2123_s30 }
  0x25   : > { %p2059_p13 = pneg %p2058_p12 }
  0x26   : > { %520 = vrot.lane.b32.xlu1 %v192_v4, %s2123_s30 }
  0x28   : > { %514 = vrot.lane.b32.xlu0 %v2211_v1, %s2123_s30  ;;  %s2130_s30 = smov [#allocation2]  }
  0x2a   : > { %689 = vrot.lane.b32.xlu1 %v188_v2, %s2124_s4 }
  0x2c   : > { %687 = vrot.lane.b32.xlu0 %v191_v3, %s2124_s4 }
  0x2e   : > { %691 = vrot.lane.b32.xlu1 %v192_v4, %s2124_s4 }
  0x30   : > { %685 = vrot.lane.b32.xlu0 %v2211_v1, %s2124_s4  ;;  %s2060_s4 = sshll.u32 %s2130_s30, 4  ;;  %s2061_s4 = int_to_ptr.vmem [resolvable:$false] %s2060_s4 }
  0x31   : > { %p2063_p0 = scmp.lt.s32.totalorder %s2361_s25, %s2061_s4 }
  0x32   : > { %860 = vrot.lane.b32.xlu1 %v188_v2, %s2125_s5 }
  0x34   : > { %858 = vrot.lane.b32.xlu0 %v191_v3, %s2125_s5 }
  0x36   : > { %862 = vrot.lane.b32.xlu1 %v192_v4, %s2125_s5 }
  0x38   : > { %856 = vrot.lane.b32.xlu0 %v2211_v1, %s2125_s5  ;;  %s2062_s5 = scalar_lea.vmem %s2061_s4, 768 }
  0x39   : > { %p2064_p1 = scmp.lt.s32.totalorder %s2062_s5, %s2056_s29 }
  0x3a   : > { %1031 = vrot.lane.b32.xlu1 %v188_v2, %s2126_s6 }
  0x3b   : > { %p2065_p2 = por %p2064_p1, %p2063_p0 }
  0x3c   : > { %1029 = vrot.lane.b32.xlu0 %v191_v3, %s2126_s6 }
  0x3d   : > { %p2066_p3 = pnand %p2065_p2, %p2059_p13 }
  0x3e   : > { %1033 = vrot.lane.b32.xlu1 %v192_v4, %s2126_s6 }
  0x40   : > { %1027 = vrot.lane.b32.xlu0 %v2211_v1, %s2126_s6 }
  0x42   : > { %1202 = vrot.lane.b32.xlu1 %v188_v2, %s2127_s7 }
  0x44   : > { %1200 = vrot.lane.b32.xlu0 %v191_v3, %s2127_s7 }
  0x46   : > { %1204 = vrot.lane.b32.xlu1 %v192_v4, %s2127_s7 }
  0x48   : > { %1198 = vrot.lane.b32.xlu0 %v2211_v1, %s2127_s7 }
  0x4a   : > { %1373 = vrot.lane.b32.xlu1 %v188_v2, %s2128_s8 }
  0x4c   : > { %1371 = vrot.lane.b32.xlu0 %v191_v3, %s2128_s8 }
  0x4e   : > { %1375 = vrot.lane.b32.xlu1 %v192_v4, %s2128_s8 }
  0x50   : > { %1369 = vrot.lane.b32.xlu0 %v2211_v1, %s2128_s8 }
  0x52   : > { %1544 = vrot.lane.b32.xlu1 %v188_v2, %s2129_s9 }
  0x54   : > { %1542 = vrot.lane.b32.xlu0 %v191_v3, %s2129_s9 }
  0x56   : > { %1546 = vrot.lane.b32.xlu1 %v192_v4, %s2129_s9  ;;  %v1855_v4 = vld [vmem:[%s2402_s1 + $0x38] sm:$0xff] }
  0x58   : > { %1540 = vrot.lane.b32.xlu0 %v2211_v1, %s2129_s9 }
  0x8c   : > { %v194_v5 = vpop.permute.xlu1 %193 }
  0x8e   : > { %v196_v6 = vpop.permute.xlu0 %195 }
  0x8f   : > { %v202_v12 = vsel %vm201_vm1, %v194_v5, %v196_v6 }
  0x90   : > { %v200_v7 = vpop.permute.xlu1 %199 }
  0x92   : > { %v198_v8 = vpop.permute.xlu0 %197 }
  0x93   : > { %v203_v10 = vsel %vm201_vm1, %v196_v6, %v198_v8  ;;  %v204_v11 = vsel %vm201_vm1, %v198_v8, %v200_v7  ;;  %v1856_v7 = vld [vmem:[%s2402_s1 + $0x40] sm:$0xff]  ;;  %v1710_v8 = vlaneseq }
  0x94   : > { %1857 = vmatprep.subr.msk.mxu0 %vm209_vm2, %v203_v10  ;;  %1925 = vmatpush3.msk.msra.mxu1 %vm209_vm2, %v204_v11  ;;  %v519_v13 = vpop.permute.xlu1 %518  ;;  %v1708_v11 = vld [vmem:[%s2403_s2] sm:$0x7] }
  0x95   : > { %1858 = vmatpush1.msk.msra.mxu0 %vm209_vm2, %v202_v12  ;;  %1927 = vmatmul.mubr.msk.f32.vlgmr.msra.gmra.mrb[0].mxu1 %vm205_vm3, %v1849_v9 }
  0x96   : > { %1859 = vmatmul.mubr.msk.f32.vlgmr.msra.gmra.mrb[0].mxu0 %vm205_vm3, %v1849_v9  ;;  %1862 = vmatprep.subr.msk.mxu0 %vm209_vm2, %v191_v3  ;;  %v517_v15 = vpop.permute.xlu0 %516  ;;  %v1711_v9 = vshrl.u32 %v1710_v8, 7 }
  0x97   : > { %1863 = vmatpush1.msk.msra.mxu0 %vm209_vm2, %v2211_v1  ;;  %v524_v16 = vsel %vm522_vm4, %v517_v15, %v519_v13  ;;  %1929 = vmatprep.subr.mxu1 %v2120_v0 }
  0x98   : > { %1930 = vmatpush3.msk.msra.mxu1 %vm209_vm2, %v187_v14  ;;  %1867 = vmatprep.subr.msk.mxu0 %vm209_vm2, %v524_v16  ;;  %v521_v17 = vpop.permute.xlu1 %520  ;;  %v1712_v10 = vsub.s32 0, %v1711_v9  ;;  %v1716_v12 = vsub.s32 1, %v1711_v9 }
  0x99   : > { %1931 = vmatprep.mubr.msk.f32.mxu1 %vm2121_vm0, %v2120_v0  ;;  %431 = vmatprep.mubr.f32.mxu0 %v2120_v0  ;;  %v525_v20 = vsel %vm522_vm4, %v519_v13, %v521_v17  ;;  %v1720_v13 = vsub.s32 2, %v1711_v9 }
  0x9a   : > { %v515_v18 = vpop.permute.xlu0 %514  ;;  %1934 = vmatprep.subr.mxu1 %v2120_v0  ;;  %v1713_v14 = vrot.slane %v1708_v11, %v1712_v10 }
  0x9b   : > { %v523_v21 = vsel %vm522_vm4, %v515_v18, %v517_v15  ;;  %v1717_v15 = vrot.slane %v1708_v11, %v1716_v12 }
  0x9c   : > { %v690_v22 = vpop.permute.xlu1 %689 }
  0x9d   : > { %1932 = vmatmul.mubr.msk.f32.vlgmr.msra.gmra.mrb[0].mxu1 %vm205_vm3, %v169_v19 }
  0x9e   : > { %1864 = vmatmul.mubr.msk.f32.vlgmr.msra.gmra.mrb[0].mxu0 %vm205_vm3, %v169_v19  ;;  %1935 = vmatpush3.msk.msra.mxu1 %vm209_vm2, %v525_v20  ;;  %v688_v23 = vpop.permute.xlu0 %687 }
  0x9f   : > { %1868 = vmatpush1.msk.msra.mxu0 %vm209_vm2, %v523_v21  ;;  %v695_v24 = vsel %vm693_vm5, %v688_v23, %v690_v22  ;;  %1936 = vmatprep.mubr.msk.f32.mxu1 %vm2121_vm0, %v2120_v0 }
  0xa0   : > { %1872 = vmatprep.subr.msk.mxu0 %vm209_vm2, %v695_v24  ;;  %v692_v25 = vpop.permute.xlu1 %691  ;;  %599 = vmatprep.mubr.f32.mxu0 %v2120_v0 }
  0xa1   : > { %1939 = vmatprep.subr.mxu1 %v2120_v0  ;;  %v696_v28 = vsel %vm693_vm5, %v690_v22, %v692_v25 }
  0xa2   : > { %v686_v26 = vpop.permute.xlu0 %685 }
  0xa3   : > { %v694_v29 = vsel %vm693_vm5, %v686_v26, %v688_v23 }
  0xa4   : > { %v861_v30 = vpop.permute.xlu1 %860 }
  0xa5   : > { %1937 = vmatmul.mubr.msk.f32.vlgmr.msra.gmra.mrb[0].mxu1 %vm205_vm3, %v1850_v27 }
  0xa6   : > { %1869 = vmatmul.mubr.msk.f32.vlgmr.msra.gmra.mrb[0].mxu0 %vm205_vm3, %v1850_v27  ;;  %1940 = vmatpush3.msk.msra.mxu1 %vm209_vm2, %v696_v28  ;;  %v859_v31 = vpop.permute.xlu0 %858 }
  0xa7   : > { %1873 = vmatpush1.msk.msra.mxu0 %vm209_vm2, %v694_v29  ;;  %v866_v32 = vsel %vm864_vm6, %v859_v31, %v861_v30  ;;  %1941 = vmatprep.mubr.msk.f32.mxu1 %vm2121_vm0, %v2120_v0 }
  0xa8   : > { %1877 = vmatprep.subr.msk.mxu0 %vm209_vm2, %v866_v32  ;;  %v863_v33 = vpop.permute.xlu1 %862  ;;  %770 = vmatprep.mubr.f32.mxu0 %v2120_v0 }
  0xa9   : > { %1944 = vmatprep.subr.mxu1 %v2120_v0  ;;  %v867_v36 = vsel %vm864_vm6, %v861_v30, %v863_v33 }
  0xaa   : > { %v857_v34 = vpop.permute.xlu0 %856 }
  0xab   : > { %v865_v37 = vsel %vm864_vm6, %v857_v34, %v859_v31 }
  0xac   : > { %v1032_v38 = vpop.permute.xlu1 %1031 }
  0xad   : > { %1942 = vmatmul.mubr.msk.f32.vlgmr.msra.gmra.mrb[0].mxu1 %vm205_vm3, %v1851_v35 }
  0xae   : > { %1874 = vmatmul.mubr.msk.f32.vlgmr.msra.gmra.mrb[0].mxu0 %vm205_vm3, %v1851_v35  ;;  %1945 = vmatpush3.msk.msra.mxu1 %vm209_vm2, %v867_v36  ;;  %v1030_v39 = vpop.permute.xlu0 %1029 }
  0xaf   : > { %1878 = vmatpush1.msk.msra.mxu0 %vm209_vm2, %v865_v37  ;;  %v1037_v40 = vsel %vm1035_vm7, %v1030_v39, %v1032_v38  ;;  %1946 = vmatprep.mubr.msk.f32.mxu1 %vm2121_vm0, %v2120_v0 }
  0xb0   : > { %1882 = vmatprep.subr.msk.mxu0 %vm209_vm2, %v1037_v40  ;;  %v1034_v41 = vpop.permute.xlu1 %1033  ;;  %941 = vmatprep.mubr.f32.mxu0 %v2120_v0 }
  0xb1   : > { %1949 = vmatprep.subr.mxu1 %v2120_v0  ;;  %v1038_v44 = vsel %vm1035_vm7, %v1032_v38, %v1034_v41 }
  0xb2   : > { %v1028_v42 = vpop.permute.xlu0 %1027 }
  0xb3   : > { %v1036_v45 = vsel %vm1035_vm7, %v1028_v42, %v1030_v39 }
  0xb4   : > { %v1203_v46 = vpop.permute.xlu1 %1202 }
  0xb5   : > { %1947 = vmatmul.mubr.msk.f32.vlgmr.msra.gmra.mrb[0].mxu1 %vm205_vm3, %v1852_v43 }
  0xb6   : > { %1879 = vmatmul.mubr.msk.f32.vlgmr.msra.gmra.mrb[0].mxu0 %vm205_vm3, %v1852_v43  ;;  %1950 = vmatpush3.msk.msra.mxu1 %vm209_vm2, %v1038_v44  ;;  %v1201_v47 = vpop.permute.xlu0 %1200 }
  0xb7   : > { %1883 = vmatpush1.msk.msra.mxu0 %vm209_vm2, %v1036_v45  ;;  %v1208_v48 = vsel %vm1206_vm8, %v1201_v47, %v1203_v46  ;;  %1951 = vmatprep.mubr.msk.f32.mxu1 %vm2121_vm0, %v2120_v0 }
  0xb8   : > { %1887 = vmatprep.subr.msk.mxu0 %vm209_vm2, %v1208_v48  ;;  %v1205_v49 = vpop.permute.xlu1 %1204  ;;  %1112 = vmatprep.mubr.f32.mxu0 %v2120_v0 }
  0xb9   : > { %1954 = vmatprep.subr.mxu1 %v2120_v0  ;;  %v1209_v52 = vsel %vm1206_vm8, %v1203_v46, %v1205_v49 }
  0xba   : > { %v1199_v50 = vpop.permute.xlu0 %1198 }
  0xbb   : > { %v1207_v53 = vsel %vm1206_vm8, %v1199_v50, %v1201_v47 }
  0xbc   : > { %v1374_v54 = vpop.permute.xlu1 %1373 }
  0xbd   : > { %1952 = vmatmul.mubr.msk.f32.vlgmr.msra.gmra.mrb[0].mxu1 %vm205_vm3, %v1853_v51 }
  0xbe   : > { %1884 = vmatmul.mubr.msk.f32.vlgmr.msra.gmra.mrb[0].mxu0 %vm205_vm3, %v1853_v51  ;;  %1955 = vmatpush3.msk.msra.mxu1 %vm209_vm2, %v1209_v52  ;;  %v1372_v55 = vpop.permute.xlu0 %1371 }
  0xbf   : > { %1888 = vmatpush1.msk.msra.mxu0 %vm209_vm2, %v1207_v53  ;;  %v1379_v56 = vsel %vm1377_vm9, %v1372_v55, %v1374_v54  ;;  %1956 = vmatprep.mubr.msk.f32.mxu1 %vm2121_vm0, %v2120_v0 }
  0xc0   : > { %1892 = vmatprep.subr.msk.mxu0 %vm209_vm2, %v1379_v56  ;;  %v1376_v57 = vpop.permute.xlu1 %1375  ;;  %1283 = vmatprep.mubr.f32.mxu0 %v2120_v0 }
  0xc1   : > { %1959 = vmatprep.subr.mxu1 %v2120_v0  ;;  %v1380_v60 = vsel %vm1377_vm9, %v1374_v54, %v1376_v57 }
  0xc2   : > { %v1370_v58 = vpop.permute.xlu0 %1369 }
  0xc3   : > { %v1378_v61 = vsel %vm1377_vm9, %v1370_v58, %v1372_v55 }
  0xc4   : > { %v1545_v62 = vpop.permute.xlu1 %1544 }
  0xc5   : > { %1957 = vmatmul.mubr.msk.f32.vlgmr.msra.gmra.mrb[0].mxu1 %vm205_vm3, %v1854_v59 }
  0xc6   : > { %1889 = vmatmul.mubr.msk.f32.vlgmr.msra.gmra.mrb[0].mxu0 %vm205_vm3, %v1854_v59  ;;  %1960 = vmatpush3.msk.msra.mxu1 %vm209_vm2, %v1380_v60  ;;  %v1543_v63 = vpop.permute.xlu0 %1542 }
  0xc7   : > { %1893 = vmatpush1.msk.msra.mxu0 %vm209_vm2, %v1378_v61  ;;  %v1550_v1 = vsel %vm1548_vm10, %v1543_v63, %v1545_v62  ;;  %1961 = vmatprep.mubr.msk.f32.mxu1 %vm2121_vm0, %v2120_v0 }
  0xc8   : > { %1897 = vmatprep.subr.msk.mxu0 %vm209_vm2, %v1550_v1  ;;  %v1547_v2 = vpop.permute.xlu1 %1546  ;;  %1454 = vmatprep.mubr.f32.mxu0 %v2120_v0 }
  0xc9   : > { %1964 = vmatprep.subr.mxu1 %v2120_v0  ;;  %v1551_v5 = vsel %vm1548_vm10, %v1545_v62, %v1547_v2 }
  0xca   : > { %v1541_v3 = vpop.permute.xlu0 %1540 }
  0xcb   : > { %v1549_v6 = vsel %vm1548_vm10, %v1541_v3, %v1543_v63 }
  0xcd   : > { %1962 = vmatmul.mubr.msk.f32.vlgmr.msra.gmra.mrb[0].mxu1 %vm205_vm3, %v1855_v4 }
  0xce   : > { %1894 = vmatmul.mubr.msk.f32.vlgmr.msra.gmra.mrb[0].mxu0 %vm205_vm3, %v1855_v4  ;;  %1965 = vmatpush3.msk.msra.mxu1 %vm209_vm2, %v1551_v5 }
  0xcf   : > { %1898 = vmatpush1.msk.msra.mxu0 %vm209_vm2, %v1549_v6  ;;  %1966 = vmatprep.mubr.msk.f32.mxu1 %vm2121_vm0, %v2120_v0 }
  0xd0   : > { %1625 = vmatprep.mubr.f32.mxu0 %v2120_v0  ;;  %v1721_v0 = vrot.slane %v1708_v11, %v1720_v13 }
  0xd5   : > { %1967 = vmatmul.mubr.msk.f32.vlgmr.msra.gmra.mrb[0].mxu1 %vm205_vm3, %v1856_v7 }
  0xd6   : > { %1899 = vmatmul.mubr.msk.f32.vlgmr.msra.gmra.mrb[0].mxu0 %vm205_vm3, %v1856_v7 }
 0x1a8   : > { %v1698_v16 = vpop.f32.mrb[0].mxu1 }
 0x1a9   : > { %v1627_v17 = vpop.f32.mrb[0].mxu0  ;;  %v1968_v18 = vpop.f32.mrb[1].mxu1  ;;  %v1727_v22 = vmul.f32 %v1721_v0, %v1698_v16 }
 0x1aa   : > { %v1725_v19 = vmul.f32 %v1713_v14, %v1627_v17  ;;  %v1629_v20 = vpop.f32.mrb[1].mxu0 }
 0x1ab   : > { %v1726_v21 = vmul.f32 %v1717_v15, %v1629_v20  ;;  %v1733_v27 = vmul.f32 %v1727_v22, %v1698_v16 }
 0x1ac   : > { %v1731_v23 = vmul.f32 %v1725_v19, %v1627_v17 }
 0x1ad   : > { %v1732_v24 = vmul.f32 %v1726_v21, %v1629_v20  ;;  %v1737_v25 = vadd.f32 %v1726_v21, %v1725_v19 }
 0x1af   : > { %v1738_v26 = vadd.f32 %v1737_v25, %v1727_v22  ;;  %v1741_v28 = vadd.f32 %v1732_v24, %v1731_v23 }
 0x1b1   : > { %1739 = vadd.xlane.f32.xlu0 %v1738_v26  ;;  %v1742_v29 = vadd.f32 %v1741_v28, %v1733_v27 }
 0x1b3   : > { %1743 = vadd.xlane.f32.xlu1 %v1742_v29 }
 0x23e   : > { %v1740_v30 = vpop.xlane.xlu0 %1739 }
 0x23f   : > { %v1745_v31 = vmul.f32 0.00390625, %v1740_v30 }
 0x240   : > { %v1744_v32 = vpop.xlane.xlu1 %1743 }
 0x241   : > { %v1747_v33 = vmul.f32 %v1745_v31, %v1745_v31  ;;  %v1746_v34 = vmul.f32 0.00390625, %v1744_v32  ;;  %v1752_v38 = vsub.f32 0.0, %v1745_v31 }
 0x243   : > { %v1748_v35 = vsub.f32 %v1746_v34, %v1747_v33 }
 0x245   : > { %v1749_v36 = vmax.f32 %v1748_v35, 0.0 }
 0x247   : > { %v1750_v37 = vadd.f32 1e-05, %v1749_v36 }
 0x249   : > { %2054 = vrsqrt.f32 %v1750_v37 }
 0x253   : > { %v2055_v39 = vpop.eup %2054 }
 0x254   : > { %v1753_v40 = vmul.f32 %v2055_v39, %v1752_v38  ;;  %v1757_v41 = vmul.f32 %v2055_v39, %v1627_v17  ;;  %v1758_v42 = vmul.f32 %v2055_v39, %v1629_v20  ;;  %v1759_v43 = vmul.f32 %v2055_v39, %v1698_v16 }
 0x256   : > { %v1760_v44 = vadd.f32 %v1757_v41, %v1753_v40  ;;  %v1761_v45 = vadd.f32 %v1758_v42, %v1753_v40  ;;  %v1762_v46 = vadd.f32 %v1759_v43, %v1753_v40 }
 0x258   : > { %v1763_v47 = vmax.f32 %v1760_v44, 0.0  ;;  %v1764_v48 = vmax.f32 %v1761_v45, 0.0  ;;  %v1765_v49 = vmax.f32 %v1762_v46, 0.0 }
 0x25a   : > { %1766 = vst [vmem:[%s163_s24] sm:$0xff] %v1763_v47  ;;  %1767 = vst [vmem:[%s163_s24 + $0x8] sm:$0xff] %v1764_v48 }
 0x25b   : > { %1768 = vst [vmem:[%s163_s24 + $0x10] sm:$0xff] %v1765_v49 }
 0x25c   : > { %2069 = shalt.err (!%p2066_p3)
}
 0x25d   : > { %s2070_s6 = scalar_lea.hbm %s2359_s28, 384  ;;  %s2074_s9 = scalar_lea.hbm %s2404_s3, 768 }
 0x25e   : > { %p2071_p4 = scmp.ne.s32.totalorder %s2359_s28, %s2070_s6  ;;  %p2075_p9 = scmp.lt.u32.totalorder %s2359_s28, %s2404_s3 }
 0x25f   : > { %p2076_p10 = scmp.lt.u32.totalorder %s2074_s9, %s2070_s6  ;;  %p2078_p12 = scmp.lt.u32.totalorder %s2070_s6, %s2359_s28 }
 0x260   : > { %p2072_p7 = pnand %p2071_p4, %p2189_p5 }
 0x261   : > { %p2077_p11 = por %p2076_p10, %p2075_p9 }
 0x262   : > { %p2073_p8 = pneg %p2072_p7 }
 0x263   : > { %p2079_p13 = por %p2078_p12, %p2077_p11 }
 0x265   : > { %p2080_p0 = pnand %p2079_p13, %p2073_p8 }
 0x267   : > { %2083 = shalt.err (!%p2080_p0)
}
 0x268   : > { %2003 = dma.vmem_to_hbm [thread:$0]  (%p2189_p5), %s2361_s25, 384, %s2359_s28, %s1770_s16  }
 0x269 PF: > { %p2009_p1 = scmp.ge.s32.totalorder %s2118_s15, 2  ;;  %s1796_s17 = sand.u32 1, %s2106_s12  }
 0x26a   : > { %s1797_s19 = scalar_lea.sflag [#allocation3], %s1796_s17 }
 0x26b   : > { %p2006_p2 = pnand %p2009_p1, %p2193_p6 }
 0x26d   : > { %2101 = dma.done.wait (!%p2006_p2), %s1797_s19, 384  }
 0x26e   : > { %2103 = vsyncadd (!%p2006_p2), %s1797_s19, 4294966912  ;;  %p13_p3 = scmp.ge.s32.totalorder %s2176_s18, 4   ;;  %s2407_s12 = smov %s2110_s13 }
 0x26f   : > { %s2408_s13 = smov %s2114_s14  ;;  %s2409_s14 = smov %s2187_s21 }
 0x270   : > { %s2410_s15 = smov %s2176_s18  ;;  %15 = sbr.rel (!%p13_p3) target bundleno = 3 (0x3), region = 75 }
 0x277   :  { %1802 = vsyncpa [#allocation3], 1 }
 0x278   :  { %1804 = vsyncpa [#allocation3 + $0x1], 1 }

</bundles_post_ra>
